<compile_context>
chip_gen: v5e
topology: v5e:2x2
jax: 0.10.0
libtpu: 0.0.40
codegen_flags: <defaults>
</compile_context>

<pallas_src>
import jax
import jax.numpy as jnp
from jax.experimental import pallas as pl
from jax.experimental.pallas import tpu as pltpu


def _attn_domain_kernel(hidden_ref, outputs_ref, mask_ref, ctx_ref):
    # hidden_ref : (bb, H)     native dtype (f32 / bf16), lane/sublane dense
    # outputs_ref: (bb, L, H)  native dtype
    # mask_ref   : (bb, L)     int8, nonzero == masked
    # ctx_ref    : (bb, H)
    h = hidden_ref[...]
    o = outputs_ref[...]
    m = mask_ref[...]

    # scores[b, l] = sum_h h[b, h] * o[b, l, h]
    # Flash-attention-canonical q.k^T dimension numbers (both operands
    # contract their lane dim H); lowers to the MXU without materializing a
    # transpose of the (L, H) outputs tile.  The q == 1 dim exists only inside
    # this contraction; the result is squeezed to a dense 2-D (bb, L) slab
    # before any softmax math.
    scores = jnp.einsum(
        "bqh,blh->bql", h[:, None, :], o,
        preferred_element_type=jnp.float32,
    )[:, 0, :]                                            # (bb, L) f32, dense

    # masked_fill(mask, -1e12) + max-subtracted softmax over L, all on dense
    # 2-D f32 vregs (no 1/8-sublane-occupancy padding).
    scores = jnp.where(m != 0, jnp.float32(-1.0e12), scores)
    mx = jnp.max(scores, axis=-1, keepdims=True)
    e = jnp.exp(scores - mx)
    denom = jnp.sum(e, axis=-1, keepdims=True)
    alpha = e / denom                                     # (bb, L) f32, exact

    # context[b, :] = sum_l alpha[b, l] * o[b, l, :]
    # Naturally-laid-out p @ v contraction (alpha contracts its lane dim,
    # o contracts its sublane dim).  alpha is cast to o.dtype (tiny) so a
    # bf16 outputs tensor feeds the MXU in bf16; accumulation stays f32.
    ctx = jnp.einsum(
        "bql,blh->bqh", alpha[:, None, :].astype(o.dtype), o,
        preferred_element_type=jnp.float32,
    )[:, 0, :]                                            # (bb, H) f32

    # Lane/sublane-dense 2-D store (unmasked vst for H a multiple of 128).
    ctx_ref[...] = ctx.astype(ctx_ref.dtype)


def _vmem_capacity_bytes():
    """Physical VMEM of the local chip; conservative 64 MiB (v7x) fallback."""
    try:
        return int(pltpu.get_tpu_info().vmem_capacity_bytes)
    except Exception:
        return 64 << 20


def _pick_block_batch(B, L, H, itemsize, vmem_cap_bytes):
    """Number of batch rows per grid step (generation-aware).

    * Targets an `outputs` tile big enough to amortize the ~0.35 us/step
      pipeline overhead: ~16 MiB on 128-MiB-VMEM chips (v5e/v6e), ~12 MiB on
      v7x (64 MiB VMEM) so the double-buffered working set still fits.
    * Guarantees >= 2 grid steps whenever the batch can be split on
      sublane-aligned boundaries, so both v7x TensorCores get work and
      prefetch/writeback overlaps on every generation.
    * Prefers bb % 32 == 0 (int8 mask tile-exact), then bb % 8 == 0.
    """
    target = (16 << 20) if vmem_cap_bytes >= (100 << 20) else (12 << 20)
    per_row = max(1, L * H * itemsize)
    cap = max(1, int(target // per_row))
    if B >= 16:
        cap = min(cap, max(8, B // 2))      # force at least 2 grid steps
    cap = min(cap, B)

    if B < 8:
        # Tiny batch: one full block (block dims == array dims keeps every
        # BlockSpec legal regardless of alignment).
        return B
    if cap < 8:
        # Sublane alignment floor: slightly exceed the target rather than
        # emit an unaligned second-to-minor block dim.
        return min(B, 8)

    for align in (32, 8):
        divs = [d for d in range(align, cap + 1, align) if B % d == 0]
        if divs:
            return max(divs)
    # No aligned divisor of B: sublane-aligned block with a masked partial
    # final block (padded rows compute garbage that is dropped on store).
    return (cap // 8) * 8


def attn_domain(hidden, outputs, mask, *, block_batch=None):
    """hidden: (B, 1, H), outputs: (B, L, H), mask: (B, L) bool/int.

    Returns context: (B, H) in outputs.dtype.  f32 and bf16 inputs are both
    consumed natively; softmax math is always f32.
    """
    B, L, H = outputs.shape
    assert hidden.shape == (B, 1, H)
    assert mask.shape == (B, L)

    # Dense 2-D hidden slab (free reshape) and 1-byte mask: cheap DMAs.
    hidden2 = jnp.reshape(hidden, (B, H))
    mask_i8 = mask if mask.dtype == jnp.int8 else mask.astype(jnp.int8)

    out_isz = jnp.dtype(outputs.dtype).itemsize
    hid_isz = jnp.dtype(hidden.dtype).itemsize
    vmem_cap = _vmem_capacity_bytes()

    bb = block_batch if block_batch is not None else _pick_block_batch(
        B, L, H, out_isz, vmem_cap)
    grid = pl.cdiv(B, bb)

    # VMEM budget from the actual working set: 2x (double-buffered tiles)
    # x 1.5 headroom for compiler temps; floor 32 MiB (lifts the v5e/v6e
    # scoped defaults), cap at 75% of this generation's physical VMEM.
    step_bytes = bb * (
        L * H * out_isz        # outputs tile
        + H * hid_isz          # hidden tile
        + L                    # int8 mask tile
        + H * out_isz          # ctx tile
    )
    vmem_limit_bytes = int(min(max(3 * step_bytes, 32 << 20),
                               (vmem_cap * 3) // 4))

    grid_spec = pltpu.PrefetchScalarGridSpec(
        num_scalar_prefetch=0,
        grid=(grid,),
        in_specs=[
            pl.BlockSpec((bb, H), lambda b: (b, 0)),        # hidden (dense 2-D)
            pl.BlockSpec((bb, L, H), lambda b: (b, 0, 0)),  # outputs
            pl.BlockSpec((bb, L), lambda b: (b, 0)),        # mask (int8)
        ],
        out_specs=pl.BlockSpec((bb, H), lambda b: (b, 0)),  # lane-dense (B, H)
    )

    return pl.pallas_call(
        _attn_domain_kernel,
        out_shape=jax.ShapeDtypeStruct((B, H), outputs.dtype),
        grid_spec=grid_spec,
        compiler_params=pltpu.CompilerParams(
            dimension_semantics=("parallel",),
            vmem_limit_bytes=vmem_limit_bytes,
        ),
    )(hidden2, outputs, mask_i8)


def _attn_domain_ref(hidden, outputs, mask):
    # Pure-JAX reference mirroring the PyTorch forward exactly (f32 math).
    o32 = outputs.astype(jnp.float32)
    h32 = hidden[:, 0, :].astype(jnp.float32)
    scores = jnp.einsum("blh,bh->bl", o32, h32)                  # (B, L)
    scores = jnp.where(mask, jnp.float32(-1.0e12), scores)
    alpha = jax.nn.softmax(scores, axis=-1)                      # (B, L)
    return jnp.einsum("bl,blh->bh", alpha, o32).astype(outputs.dtype)


if __name__ == "__main__":
    B, L, H = 2, 8, 32
    key = jax.random.PRNGKey(0)
    k_h, k_o, k_m = jax.random.split(key, 3)

    hidden = jax.random.normal(k_h, (B, 1, H), dtype=jnp.float32)
    outputs = jax.random.normal(k_o, (B, L, H), dtype=jnp.float32)
    # Deterministic mask with some masked positions (never a fully-masked row).
    mask = jax.random.uniform(k_m, (B, L)) > 0.7
    mask = mask.at[:, 0].set(False)

    ctx = attn_domain(hidden, outputs, mask)
    ctx = jax.block_until_ready(ctx)

    ref = _attn_domain_ref(hidden, outputs, mask)
    assert ctx.shape == (B, H)
    # MXU f32 accumulation / default matmul precision -> relaxed tolerance.
    assert jnp.allclose(ctx, ref, atol=2e-3, rtol=2e-3), float(
        jnp.max(jnp.abs(ctx - ref)))

    print("KERNEL_OK")
</pallas_src>

<mosaic_0001>
module attributes {stable_mosaic.version = 11 : i64} {
  func.func @_attn_domain_kernel(%arg0: i32, %arg1: memref<2x32xf32, #tpu.memory_space<vmem>>, %arg2: memref<2x8x32xf32, #tpu.memory_space<vmem>>, %arg3: memref<2x8xi8, #tpu.memory_space<vmem>>, %arg4: memref<2x32xf32, #tpu.memory_space<vmem>>) attributes {dimension_semantics = [#tpu.dimension_semantics<parallel>], iteration_bounds = array<i64: 1>, scalar_prefetch = 0 : i64, scratch_operands = 0 : i64, tpu.core_type = #tpu.core_type<tc>, window_params = [{transform_indices = @transform_0, window_bounds = array<i64: 2, 32>}, {transform_indices = @transform_1, window_bounds = array<i64: 2, 8, 32>}, {transform_indices = @transform_2, window_bounds = array<i64: 2, 8>}, {transform_indices = @transform_3, window_bounds = array<i64: 2, 32>}]} {
    %c0 = arith.constant 0 : index
    %c0_0 = arith.constant 0 : index
    %0 = vector.load %arg1[%c0, %c0_0] : memref<2x32xf32, #tpu.memory_space<vmem>>, vector<2x32xf32>
    %c0_1 = arith.constant 0 : index
    %c0_2 = arith.constant 0 : index
    %c0_3 = arith.constant 0 : index
    %1 = vector.load %arg2[%c0_1, %c0_2, %c0_3] : memref<2x8x32xf32, #tpu.memory_space<vmem>>, vector<2x8x32xf32>
    %c0_4 = arith.constant 0 : index
    %c0_5 = arith.constant 0 : index
    %2 = vector.load %arg3[%c0_4, %c0_5] : memref<2x8xi8, #tpu.memory_space<vmem>>, vector<2x8xi8>
    %3 = vector.shape_cast %0 : vector<2x32xf32> to vector<2x1x32xf32>
    "tpu.trace_start"() <{level = 10 : i32, message = "bqh,blh->bql"}> : () -> ()
    %cst = arith.constant dense<0.000000e+00> : vector<2x1x8xf32>
    %4 = tpu.matmul %3, %1, %cst {dimension_numbers = #tpu.dot_dimension_numbers<[2], [2], [1], [1], [0, 0, 0, 1, 1, 1], [0], [0]>} : vector<2x1x32xf32>, vector<2x8x32xf32>, vector<2x1x8xf32> -> vector<2x1x8xf32>
    "tpu.trace_stop"() : () -> ()
    %5 = vector.shape_cast %4 : vector<2x1x8xf32> to vector<2x8xf32>
    %c0_i8 = arith.constant 0 : i8
    %6 = vector.broadcast %c0_i8 : i8 to vector<2x8xi8>
    %7 = arith.cmpi ne, %2, %6 : vector<2x8xi8>
    %cst_6 = arith.constant -9.99999995E+11 : f32
    %8 = vector.broadcast %cst_6 : f32 to vector<2x8xf32>
    %9 = arith.select %7, %8, %5 : vector<2x8xi1>, vector<2x8xf32>
    %cst_7 = arith.constant dense<0xFF800000> : vector<2xf32>
    %10 = vector.multi_reduction <maximumf>, %9, %cst_7 [1] : vector<2x8xf32> to vector<2xf32>
    %11 = vector.shape_cast %10 : vector<2xf32> to vector<2x1xf32>
    %12 = vector.broadcast %11 : vector<2x1xf32> to vector<2x8xf32>
    %13 = arith.subf %9, %12 : vector<2x8xf32>
    %14 = math.exp %13 : vector<2x8xf32>
    %cst_8 = arith.constant dense<0.000000e+00> : vector<2xf32>
    %15 = vector.multi_reduction <add>, %14, %cst_8 [1] : vector<2x8xf32> to vector<2xf32>
    %16 = vector.shape_cast %15 : vector<2xf32> to vector<2x1xf32>
    %17 = vector.broadcast %16 : vector<2x1xf32> to vector<2x8xf32>
    %18 = arith.divf %14, %17 : vector<2x8xf32>
    %19 = vector.shape_cast %18 : vector<2x8xf32> to vector<2x1x8xf32>
    "tpu.trace_start"() <{level = 10 : i32, message = "bql,blh->bqh"}> : () -> ()
    %cst_9 = arith.constant dense<0.000000e+00> : vector<2x1x32xf32>
    %20 = tpu.matmul %19, %1, %cst_9 {dimension_numbers = #tpu.dot_dimension_numbers<[2], [1], [1], [2], [0, 0, 0, 1, 1, 2], [0], [0]>} : vector<2x1x8xf32>, vector<2x8x32xf32>, vector<2x1x32xf32> -> vector<2x1x32xf32>
    "tpu.trace_stop"() : () -> ()
    %21 = vector.shape_cast %20 : vector<2x1x32xf32> to vector<2x32xf32>
    %c0_10 = arith.constant 0 : index
    %c0_11 = arith.constant 0 : index
    %22 = vector.load %arg4[%c0_10, %c0_11] : memref<2x32xf32, #tpu.memory_space<vmem>>, vector<2x32xf32>
    tpu.vector_store %arg4[%c0_10, %c0_11], %21 {strides = array<i32>} : memref<2x32xf32, #tpu.memory_space<vmem>>, vector<2x32xf32>,
    return
  }
  func.func @transform_0(%arg0: i32) -> (i32, i32) {
    %c0_i32 = arith.constant 0 : i32
    %c0_i32_0 = arith.constant 0 : i32
    return %arg0, %c0_i32 : i32, i32
  }
  func.func @transform_1(%arg0: i32) -> (i32, i32, i32) {
    %c0_i32 = arith.constant 0 : i32
    %c0_i32_0 = arith.constant 0 : i32
    %c0_i32_1 = arith.constant 0 : i32
    return %arg0, %c0_i32, %c0_i32_0 : i32, i32, i32
  }
  func.func @transform_2(%arg0: i32) -> (i32, i32) {
    %c0_i32 = arith.constant 0 : i32
    %c0_i32_0 = arith.constant 0 : i32
    return %arg0, %c0_i32 : i32, i32
  }
  func.func @transform_3(%arg0: i32) -> (i32, i32) {
    %c0_i32 = arith.constant 0 : i32
    %c0_i32_0 = arith.constant 0 : i32
    return %arg0, %c0_i32 : i32, i32
  }
}

</mosaic_0001>

<bundles_post_ra>
// kernel: tpu_custom_call.1
= control target key start
LH: loop header
LB: loop body
LE: loop exit
PB: predicated region body
PF: predicated region fallthrough
CT: control target
= control target key end

     0   :  { %8 = vsyncpa [#allocation3], 0  ;;  %s394_s0 = inlined_call_operand.hbm [shape: f32[2,32], index: 0, kind: input, shape index: {}]   ;;  %s395_s1 = inlined_call_operand.hbm [shape: f32[2,8,32], index: 1, kind: input, shape index: {}]   ;;  %s396_s2 = inlined_call_operand.vmem [shape: s8[2,8], index: 2, kind: input, shape index: {}]   ;;  %s397_s3 = inlined_call_operand.hbm [shape: f32[2,32], index: 3, kind: output, shape index: {}]  }
   0x1   :  { %9 = vsyncpa [#allocation6], 0 }
   0x2   :  { %10 = vsyncpa [#allocation4], 0  ;;  %s16_s14 = sshll.u32 %s394_s0, 4  ;;  %s351_s15 = smov [#allocation2]   ;;  %s17_s14 = int_to_ptr.hbm [resolvable:$true] %s16_s14 }
   0x3   :  { %s18_s16 = sshll.u32 %s351_s15, 4  ;;  %s26_s19 = sshll.u32 %s395_s1, 4  ;;  %s19_s16 = int_to_ptr.vmem [resolvable:$true] %s18_s16  ;;  %s27_s19 = int_to_ptr.hbm [resolvable:$true] %s26_s19 }
   0x4   :  { %21 = dma.hbm_to_vmem [thread:$0]  %s17_s14, 32, %s19_s16, [#allocation3]  }
   0x5   :  { %s352_s20 = smov [#allocation5]   ;;  %s353_s22 = smov 128  }
   0x6   :  { %s28_s21 = sshll.u32 %s352_s20, 4  ;;  %s354_s23 = smov 8   ;;  %s29_s21 = int_to_ptr.vmem [resolvable:$true] %s28_s21 }
   0x7   :  { %34 = dma.hbm_to_vmem [thread:$0]  %s27_s19, 256, %s29_s21, [#allocation6], %s353_s22, %s353_s22, %s354_s23  }
   0x8   :  { %345 = dma.done.wait [#allocation3], 32  }
   0x9   :  { %346 = vsyncadd [#allocation3], 4294967264 }
   0xa   :  { %347 = dma.done.wait [#allocation6], 256  }
   0xb   :  { %348 = vsyncadd [#allocation6], 4294967040  ;;  %vm53_vm0 = vcmask 261120   ;;  %v49_v0 = vld [vmem:[#allocation5 + $0x8] sm:$0xff]  ;;  %v48_v1 = vld [vmem:[#allocation5] sm:$0xff]  ;;  %v355_v5 = vmov 0  }
   0xc   :  { %v47_v2 = vld [vmem:[#allocation2] sm:$0x3]  ;;  %255 = vmatpush.xpose.msk.msra.mxu1 %vm53_vm0, %v49_v0  ;;  %253 = vmatpush.xpose.msk.msra.mxu0 %vm53_vm0, %v48_v1  ;;  %vm122_vm6 = vcmask 1041409   ;;  %vm125_vm7 = vcmask 58368   ;;  %vm181_vm14 = vcmask 64512   ;;  %s242_s27 = sshll.u32 %s397_s3, 4  ;;  %s243_s27 = int_to_ptr.hbm [resolvable:$true] %s242_s27 }
   0xd   :  { %v52_v3 = vrot.slane %v47_v2, 1  ;;  %200 = vmatpush.msra.mxu2 %v48_v1  ;;  %223 = vmatpush.msra.mxu3 %v49_v0  ;;  %v50_v4 = vld [vmem:[%s396_s2] sm:$0x1]  ;;  %s356_s2 = smov [#allocation7]  }
   0xe   :  { %vm104_vm1 = vnez %v50_v4  ;;  %s240_s24 = sshll.u32 %s356_s2, 4  ;;  %s241_s24 = int_to_ptr.vmem [resolvable:$true] %s240_s24 }
   0xf   :  { %256 = vmatmul.msk.f32.vlgmr.msra.gmra.mxu1 %vm53_vm0, %v52_v3  ;;  %254 = vmatmul.msk.f32.vlgmr.msra.gmra.mxu0 %vm53_vm0, %v47_v2  ;;  %v105_v6 = vsel %vm104_vm1, 16843009, %v355_v5  ;;  %vm233_vm1 = vcmask 254976  }
  0x10   :  { %v107_v7 = vshrl.u32 %v105_v6, 8  ;;  %vm109_vm3 = vnez %v105_v6 }
  0x11   :  { %v111_v9 = vsel %vm109_vm3, 16843009, %v355_v5 }
  0x12   :  { %vm110_vm2 = vnez %v107_v7  ;;  %v113_v11 = vunpack.c.0.s8 %v111_v9 }
  0x13   :  { %v112_v8 = vsel %vm110_vm2, 16843009, %v355_v5 }
  0x14   :  { %v114_v10 = vunpack.c.0.s8 %v112_v8  ;;  %vm115_vm5 = vcmp.ne.s32.totalorder %v113_v11, 0 }
  0x16   :  { %vm116_vm4 = vcmp.ne.s32.totalorder %v114_v10, 0 }
  0x8c   :  { %v101_v12 = vpop.f32.mrf.mxu1  ;;  %v76_v13 = vpop.f32.mrf.mxu0 }
  0x8d   :  { %v118_v14 = vsel %vm116_vm4, -1e+12, %v101_v12  ;;  %v117_v15 = vsel %vm115_vm5, -1e+12, %v76_v13 }
  0x8e   :  { %v121_v16 = vrot.slane %v118_v14, 7 }
  0x90   :  { %v123_v17 = vsel %vm122_vm6, %v121_v16, %v117_v15 }
  0x91   :  { %v126_v18 = vsel %vm125_vm7, %v123_v17, -inf }
  0x92   :  { %127 = vmax.xlane.f32.xlu0 %v126_v18 }
 0x105   :  { %v128_v19 = vpop.xlane.xlu0 %127 }
 0x106   :  { %v130_v20 = vrot.slane %v128_v19, 1  ;;  %v133_v21 = vsub.f32 %v117_v15, %v128_v19 }
 0x108   :  { %v134_v22 = vsub.f32 %v118_v14, %v130_v20  ;;  %v135_v23 = vmul.f32 1.442695, %v133_v21 }
 0x10a   :  { %v137_v24 = vmul.f32 1.442695, %v134_v22 }
 0x10c   :  { %265 = vpow2.f32 %v137_v24 }
 0x10d   :  { %267 = vpow2.f32 %v135_v23 }
 0x112   :  { %v266_v25 = vpop.eup %265 }
 0x113   :  { %v141_v26 = vrot.slane %v266_v25, 7  ;;  %v268_v27 = vpop.eup %267 }
 0x115   :  { %v142_v28 = vsel %vm122_vm6, %v141_v26, %v268_v27 }
 0x116   :  { %v144_v29 = vsel %vm125_vm7, %v142_v28, 0.0 }
 0x117   :  { %145 = vadd.xlane.f32.xlu0 %v144_v29 }
 0x18a   :  { %v146_v30 = vpop.xlane.xlu0 %145 }
 0x18b   :  { %v148_v31 = vrot.slane %v146_v30, 1  ;;  %269 = vrcp.f32 %v146_v30  ;;  %v162_v37 = vand.u32 2147483648, %v146_v30  ;;  %v160_v39 = vand.u32 2147483647, %v146_v30 }
 0x18c   :  { %vm156_vm9 = vweird.f32 %v146_v30 }
 0x18d   :  { %271 = vrcp.f32 %v148_v31  ;;  %v177_v41 = vand.u32 2147483648, %v148_v31  ;;  %v175_v44 = vand.u32 2147483647, %v148_v31  ;;  %v163_v45 = vor.u32 1.1754944e-38, %v162_v37 }
 0x18e   :  { %vm161_vm12 = vcmp.eq.f32.partialorder %v160_v39, 8.507059e+37  ;;  %vm171_vm13 = vweird.f32 %v148_v31 }
 0x18f   :  { %v178_v49 = vor.u32 1.1754944e-38, %v177_v41  ;;  %vm176_vm0 = vcmp.eq.f32.partialorder %v175_v44, 8.507059e+37 }
 0x191   :  { %v270_v32 = vpop.eup %269 }
 0x192   :  { %v152_v33 = vmul.f32 %v270_v32, %v146_v30  ;;  %vm157_vm8 = vweird.f32 %v270_v32 }
 0x193   :  { %v272_v34 = vpop.eup %271  ;;  %vm158_vm11 = vmor %vm156_vm9, %vm157_vm8 }
 0x194   :  { %v153_v35 = vsub.f32 1.0, %v152_v33  ;;  %v167_v36 = vmul.f32 %v272_v34, %v148_v31  ;;  %vm172_vm10 = vweird.f32 %v272_v34 }
 0x195   :  { %vm173_vm15 = vmor %vm171_vm13, %vm172_vm10 }
 0x196   :  { %v154_v38 = vmul.f32 %v270_v32, %v153_v35  ;;  %v168_v40 = vsub.f32 1.0, %v167_v36 }
 0x198   :  { %v155_v42 = vadd.f32 %v270_v32, %v154_v38  ;;  %v169_v43 = vmul.f32 %v272_v34, %v168_v40 }
 0x19a   :  { %v159_v46 = vsel %vm158_vm11, %v270_v32, %v155_v42  ;;  %v170_v47 = vadd.f32 %v272_v34, %v169_v43 }
 0x19b   :  { %v164_v48 = vsel %vm161_vm12, %v163_v45, %v159_v46 }
 0x19c   :  { %v165_v50 = vmul.f32 %v268_v27, %v164_v48  ;;  %v174_v51 = vsel %vm173_vm15, %v272_v34, %v170_v47 }
 0x19d   :  { %v179_v52 = vsel %vm176_vm0, %v178_v49, %v174_v51 }
 0x19e   :  { %257 = vmatmul.msk.f32.vlgmr.msra.gmra.mxu2 %vm181_vm14, %v165_v50  ;;  %v180_v53 = vmul.f32 %v266_v25, %v179_v52 }
 0x1a0   :  { %258 = vmatmul.msk.f32.vlgmr.msra.gmra.mxu3 %vm181_vm14, %v180_v53 }
 0x221   :  { %v202_v56 = vpop.f32.mrf.mxu2 }
 0x223   :  { %v225_v54 = vpop.f32.mrf.mxu3 }
 0x224   :  { %v230_v55 = vrot.slane %v225_v54, 7 }
 0x226   :  { %v231_v57 = vsel %vm122_vm6, %v230_v55, %v202_v56 }
 0x227   :  { %234 = vst.msk [vmem:[#allocation7] sm:$0x3] %vm233_vm1, %v231_v57 }
 0x228   :  { %245 = dma.vmem_to_hbm [thread:$0]  %s241_s24, 32, %s243_s27, [#allocation4]  }
 0x229   :  { %349 = dma.done.wait [#allocation4], 32  }
 0x22a   :  { %350 = vsyncadd [#allocation4], 4294967264 }
 0x22b   :  { %250 = vsyncpa [#allocation3], 1 }
 0x22c   :  { %251 = vsyncpa [#allocation6], 1 }
 0x22d   :  { %252 = vsyncpa [#allocation4], 1 }

</bundles_post_ra>
